<compile_context>
chip_gen: v6e
topology: v6e:2x2x1
jax: 0.10.0
libtpu: 0.0.40
codegen_flags: <defaults>
</compile_context>

<pallas_src>
import functools

import jax
import jax.numpy as jnp
from jax import lax
from jax.experimental import pallas as pl
from jax.experimental.pallas import tpu as pltpu

_LANE = 128
_SUBLANE = 8
_TM_CANDIDATES = (1024, 512, 256, 128, 64, 32, 16, 8)
_STEP_OVERHEAD_ROWS = 64          # ~0.35us per grid step expressed in "rows" of HBM time
_MAX_UNROLLED_BLOCKS = 4


def _round_up(x, m):
    return ((x + m - 1) // m) * m


def _pick_tile_m(M):
    """Pick an M tile balancing padding waste (Mp - M) against per-grid-step overhead."""
    best = None
    for tm in _TM_CANDIDATES:
        Mp = _round_up(M, tm)
        cost = Mp + _STEP_OVERHEAD_ROWS * (Mp // tm)
        if best is None or cost < best[0]:
            best = (cost, tm, Mp)
    return best[1], best[2]


def _invariant_spec(shape, index_map):
    """Grid-invariant operand: one VMEM buffer suffices (block index never changes)."""
    try:
        return pl.BlockSpec(shape, index_map, pipeline_mode=pl.Buffered(1))
    except TypeError:  # older jax without pipeline_mode kwarg: fall back to default buffering
        return pl.BlockSpec(shape, index_map)


# ---------------- fused kernel ---------------------------------------------------------------

def _fused_kernel(n_blocks, with_hidden, *refs):
    if with_hidden:
        (x_ref, pre_w, pre_b, w1s, b1s, w2s, b2s, post_w, post_b,
         out_ref, hid_ref) = refs
    else:
        (x_ref, pre_w, pre_b, w1s, b1s, w2s, b2s, post_w, post_b,
         out_ref) = refs
        hid_ref = None

    cdtype = w1s.dtype

    # pre: (tm, d_model) @ (d_model, Dp) -> (tm, Dp), f32 accumulation on the MXU.
    # Padded output lanes of h are exactly 0 (pre_w padded cols and pre_b padded lanes are 0).
    h = jnp.dot(x_ref[...], pre_w[...], preferred_element_type=jnp.float32) + pre_b[...]

    def block_step(blk, h):
        if hid_ref is not None:
            hid_ref[blk] = h.astype(hid_ref.dtype)       # hidden state = input of block `blk`
        t = jnp.dot(h.astype(cdtype), w1s[blk],
                    preferred_element_type=jnp.float32) + b1s[blk]
        t = jnp.maximum(t, 0.0)                          # ReLU (VPU, f32)
        return h + (jnp.dot(t.astype(cdtype), w2s[blk],
                            preferred_element_type=jnp.float32) + b2s[blk])

    if n_blocks <= _MAX_UNROLLED_BLOCKS:
        for blk in range(n_blocks):                      # small: static unroll
            h = block_step(blk, h)
    else:
        h = lax.fori_loop(0, n_blocks, block_step, h)    # large: bounded live ranges

    out = jnp.dot(h.astype(cdtype), post_w[...],
                  preferred_element_type=jnp.float32) + post_b[...]
    out_ref[...] = out.astype(out_ref.dtype)


def _fused_forward(x2d, params, n_blocks, with_hidden, *, tm):
    """x2d: [Mp, d_model] (M padded to tm multiple, last dim deliberately unpadded)."""
    (pre_w, pre_b, w1s, b1s, w2s, b2s, post_w, post_b) = params
    Mp, Dm = x2d.shape
    Dp = pre_w.shape[1]
    Fp = w1s.shape[-1]
    cdtype = x2d.dtype
    itemsize = jnp.dtype(cdtype).itemsize

    in_specs = [
        pl.BlockSpec((tm, Dm), lambda i: (i, 0)),                    # activations stream over M
        _invariant_spec((Dm, Dp), lambda i: (0, 0)),                 # pre_w  (K unpadded)
        _invariant_spec((1, Dp), lambda i: (0, 0)),                  # pre_b
        _invariant_spec((n_blocks, Dp, Fp), lambda i: (0, 0, 0)),    # stacked W1
        _invariant_spec((n_blocks, 1, Fp), lambda i: (0, 0, 0)),     # stacked b1
        _invariant_spec((n_blocks, Fp, Dp), lambda i: (0, 0, 0)),    # stacked W2
        _invariant_spec((n_blocks, 1, Dp), lambda i: (0, 0, 0)),     # stacked b2
        _invariant_spec((Dp, Dp), lambda i: (0, 0)),                 # post_w
        _invariant_spec((1, Dp), lambda i: (0, 0)),                  # post_b
    ]

    out_shape = [jax.ShapeDtypeStruct((Mp, Dp), cdtype)]             # lane-dense output
    out_specs = [pl.BlockSpec((tm, Dp), lambda i: (i, 0))]
    if with_hidden:
        out_shape.append(jax.ShapeDtypeStruct((n_blocks, Mp, Dp), cdtype))
        out_specs.append(pl.BlockSpec((n_blocks, tm, Dp), lambda i: (0, i, 0)))

    # Explicit VMEM budget (weights counted 2x as headroom even when single-buffered).
    weight_elems = (Dm * Dp + Dp + n_blocks * (Dp * Fp + Fp + Fp * Dp + Dp)
                    + Dp * Dp + Dp)
    act_elems = 2 * tm * Dm + 2 * tm * Dp + (2 * n_blocks * tm * Dp if with_hidden else 0)
    scratch_bytes = 4 * tm * (Dp + Fp)                               # f32 h / t intermediates
    need = (2 * weight_elems + act_elems) * itemsize + scratch_bytes
    vmem_limit = int(min(max(int(1.5 * need) + (8 << 20), 32 << 20), 100 << 20))

    flops = 2 * Mp * (Dm * Dp + n_blocks * 2 * Dp * Fp + Dp * Dp)
    bytes_accessed = (Mp * Dm + Mp * Dp + weight_elems
                      + (n_blocks * Mp * Dp if with_hidden else 0)) * itemsize
    cost = pl.CostEstimate(flops=int(flops), transcendentals=0,
                           bytes_accessed=int(bytes_accessed))

    kernel = functools.partial(_fused_kernel, n_blocks, with_hidden)
    return pl.pallas_call(
        kernel,
        out_shape=tuple(out_shape),
        grid=(Mp // tm,),
        in_specs=in_specs,
        out_specs=tuple(out_specs),
        compiler_params=pltpu.CompilerParams(
            dimension_semantics=("parallel",),           # shard M tiles across TCs (v7x)
            vmem_limit_bytes=vmem_limit),
        cost_estimate=cost,
    )(x2d, pre_w, pre_b, w1s, b1s, w2s, b2s, post_w, post_b)


# ---------------- Model_ZERO equivalent ------------------------------------------------------

class ModelZeroPallas:
    def __init__(self, key, d_model=32, d_ff=64, n_blocks=2,
                 param_dtype=jnp.float32, compute_dtype=jnp.bfloat16):
        self.d_model = d_model
        self.d_ff = d_ff
        self.n_blocks = n_blocks
        self.compute_dtype = compute_dtype
        self.Dp = _round_up(d_model, _LANE)
        self.Fp = _round_up(d_ff, _LANE)

        ks = jax.random.split(key, 2 + 2 * n_blocks)
        s = 0.02
        pre_w = (s * jax.random.normal(ks[0], (d_model, d_model))).astype(param_dtype)
        pre_b = jnp.zeros((d_model,), param_dtype)
        post_w = (s * jax.random.normal(ks[1], (d_model, d_model))).astype(param_dtype)
        post_b = jnp.zeros((d_model,), param_dtype)
        w1s, b1s, w2s, b2s = [], [], [], []
        for i in range(n_blocks):
            k1, k2 = ks[2 + 2 * i], ks[3 + 2 * i]
            w1s.append((s * jax.random.normal(k1, (d_model, d_ff))).astype(param_dtype))
            b1s.append(jnp.zeros((d_ff,), param_dtype))
            w2s.append((s * jax.random.normal(k2, (d_ff, d_model))).astype(param_dtype))
            b2s.append(jnp.zeros((d_model,), param_dtype))

        # Raw f32 params kept for the pure-JAX reference / parity checks.
        self._raw = dict(
            pre_w=pre_w.astype(jnp.float32), pre_b=pre_b.astype(jnp.float32),
            post_w=post_w.astype(jnp.float32), post_b=post_b.astype(jnp.float32),
            w1=jnp.stack(w1s).astype(jnp.float32), b1=jnp.stack(b1s).astype(jnp.float32),
            w2=jnp.stack(w2s).astype(jnp.float32), b2=jnp.stack(b2s).astype(jnp.float32))

        cd = compute_dtype
        Dp, Fp = self.Dp, self.Fp

        def padc(a, cols):      # pad trailing (output) dim only
            return jnp.pad(a, ((0, 0), (0, cols - a.shape[1]))).astype(cd)

        def pad2(a, rows, cols):
            return jnp.pad(a, ((0, rows - a.shape[0]), (0, cols - a.shape[1]))).astype(cd)

        def padb(b, cols):
            return jnp.pad(b, ((0, cols - b.shape[0]),)).reshape(1, cols).astype(cd)

        # Padded, lane-dense, stacked parameters; zero padding is mathematically inert
        # (padded lanes stay exactly 0 through every matmul / bias / ReLU / residual).
        self.pre_w_p = padc(pre_w, Dp)                           # [d_model, Dp]
        self.pre_b_p = padb(pre_b, Dp)
        self.post_w_p = pad2(post_w, Dp, Dp)
        self.post_b_p = padb(post_b, Dp)
        self.w1s_p = jnp.stack([pad2(w, Dp, Fp) for w in w1s])   # [n_blocks, Dp, Fp]
        self.b1s_p = jnp.stack([padb(b, Fp) for b in b1s])       # [n_blocks, 1, Fp]
        self.w2s_p = jnp.stack([pad2(w, Fp, Dp) for w in w2s])   # [n_blocks, Fp, Dp]
        self.b2s_p = jnp.stack([padb(b, Dp) for b in b2s])       # [n_blocks, 1, Dp]

    def __call__(self, x, return_hidden_states=False):
        B, S, D = x.shape
        assert D == self.d_model
        M = B * S
        tm, Mp = _pick_tile_m(M)

        # Activation slab passed lane-UNpadded ([Mp, d_model]); legal because the block's last
        # dim equals the full array dim.  Only M is padded (to a tm multiple).
        x2d = x.reshape(M, D).astype(self.compute_dtype)
        if Mp != M:
            x2d = jnp.pad(x2d, ((0, Mp - M), (0, 0)))

        params = (self.pre_w_p, self.pre_b_p, self.w1s_p, self.b1s_p,
                  self.w2s_p, self.b2s_p, self.post_w_p, self.post_b_p)
        res = _fused_forward(x2d, params, self.n_blocks, return_hidden_states, tm=tm)

        out = res[0][:M, :D].astype(x.dtype).reshape(B, S, D)
        if return_hidden_states:
            hid = res[1][:, :M, :D].astype(x.dtype).reshape(self.n_blocks, B, S, D)
            return out, hid
        return out

    def reference(self, x, return_hidden_states=False):
        """Pure-JAX float32 reference of Model_ZERO's forward (for correctness checks)."""
        r = self._raw
        h = x.astype(jnp.float32) @ r["pre_w"] + r["pre_b"]
        hids = []
        for blk in range(self.n_blocks):
            hids.append(h)
            t = jnp.maximum(h @ r["w1"][blk] + r["b1"][blk], 0.0)
            h = h + t @ r["w2"][blk] + r["b2"][blk]
        out = h @ r["post_w"] + r["post_b"]
        if return_hidden_states:
            return out, jnp.stack(hids)
        return out


if __name__ == "__main__":
    key = jax.random.PRNGKey(0)
    kx, kp = jax.random.split(key)

    B, S, D = 2, 8, 32
    x = jax.random.normal(kx, (B, S, D), dtype=jnp.float32)

    model = ModelZeroPallas(kp, d_model=D, d_ff=64, n_blocks=2)                 # bf16 compute
    model_f32 = ModelZeroPallas(kp, d_model=D, d_ff=64, n_blocks=2,
                                compute_dtype=jnp.float32)                      # parity mode

    y = model(x, return_hidden_states=False)
    y2, hid = model(x, return_hidden_states=True)
    y_f32 = model_f32(x, return_hidden_states=False)
    jax.block_until_ready((y, y2, hid, y_f32))

    ref_out, ref_hid = model.reference(x, return_hidden_states=True)

    assert y.shape == (B, S, D)
    assert y2.shape == (B, S, D)
    assert hid.shape == (2, B, S, D)
    # f32 parity mode matches the pure-JAX float32 reference tightly.
    assert bool(jnp.allclose(y_f32, ref_out, atol=1e-5, rtol=1e-5))
    # the two bf16 kernel variants agree on the main output
    assert bool(jnp.allclose(y, y2, atol=1e-5, rtol=1e-5))
    # bf16 fast path matches the f32 reference at bf16 precision
    assert bool(jnp.allclose(y, ref_out, atol=1e-2, rtol=5e-2))
    assert bool(jnp.allclose(hid, ref_hid, atol=1e-2, rtol=5e-2))
    print("KERNEL_OK")
</pallas_src>

<mosaic_0001>
module attributes {stable_mosaic.version = 11 : i64} {
  func.func @_fused_kernel(%arg0: i32, %arg1: memref<16x32xbf16, #tpu.memory_space<vmem>>, %arg2: memref<32x128xbf16, #tpu.memory_space<vmem>>, %arg3: memref<1x128xbf16, #tpu.memory_space<vmem>>, %arg4: memref<2x128x128xbf16, #tpu.memory_space<vmem>>, %arg5: memref<2x1x128xbf16, #tpu.memory_space<vmem>>, %arg6: memref<2x128x128xbf16, #tpu.memory_space<vmem>>, %arg7: memref<2x1x128xbf16, #tpu.memory_space<vmem>>, %arg8: memref<128x128xbf16, #tpu.memory_space<vmem>>, %arg9: memref<1x128xbf16, #tpu.memory_space<vmem>>, %arg10: memref<16x128xbf16, #tpu.memory_space<vmem>>) attributes {dimension_semantics = [#tpu.dimension_semantics<parallel>], iteration_bounds = array<i64: 1>, scalar_prefetch = 0 : i64, scratch_operands = 0 : i64, tpu.core_type = #tpu.core_type<tc>, window_params = [{transform_indices = @transform_0, window_bounds = array<i64: 16, 32>}, {pipeline_mode = #tpu.pipeline_mode<synchronous>, transform_indices = @transform_1, window_bounds = array<i64: 32, 128>}, {pipeline_mode = #tpu.pipeline_mode<synchronous>, transform_indices = @transform_2, window_bounds = array<i64: 1, 128>}, {pipeline_mode = #tpu.pipeline_mode<synchronous>, transform_indices = @transform_3, window_bounds = array<i64: 2, 128, 128>}, {pipeline_mode = #tpu.pipeline_mode<synchronous>, transform_indices = @transform_4, window_bounds = array<i64: 2, 1, 128>}, {pipeline_mode = #tpu.pipeline_mode<synchronous>, transform_indices = @transform_5, window_bounds = array<i64: 2, 128, 128>}, {pipeline_mode = #tpu.pipeline_mode<synchronous>, transform_indices = @transform_6, window_bounds = array<i64: 2, 1, 128>}, {pipeline_mode = #tpu.pipeline_mode<synchronous>, transform_indices = @transform_7, window_bounds = array<i64: 128, 128>}, {pipeline_mode = #tpu.pipeline_mode<synchronous>, transform_indices = @transform_8, window_bounds = array<i64: 1, 128>}, {transform_indices = @transform_9, window_bounds = array<i64: 16, 128>}]} {
    %c0 = arith.constant 0 : index
    %c0_0 = arith.constant 0 : index
    %0 = vector.load %arg1[%c0, %c0_0] : memref<16x32xbf16, #tpu.memory_space<vmem>>, vector<16x32xbf16>
    %c0_1 = arith.constant 0 : index
    %c0_2 = arith.constant 0 : index
    %1 = vector.load %arg2[%c0_1, %c0_2] : memref<32x128xbf16, #tpu.memory_space<vmem>>, vector<32x128xbf16>
    %cst = arith.constant dense<0.000000e+00> : vector<16x128xf32>
    %2 = tpu.matmul %0, %1, %cst {dimension_numbers = #tpu.dot_dimension_numbers<[1], [0], [0], [1], [0, 0, 1, 1], [], []>} : vector<16x32xbf16>, vector<32x128xbf16>, vector<16x128xf32> -> vector<16x128xf32>
    %c0_3 = arith.constant 0 : index
    %c0_4 = arith.constant 0 : index
    %3 = vector.load %arg3[%c0_3, %c0_4] : memref<1x128xbf16, #tpu.memory_space<vmem>>, vector<1x128xbf16>
    %4 = arith.extf %3 : vector<1x128xbf16> to vector<1x128xf32>
    %5 = vector.broadcast %4 : vector<1x128xf32> to vector<16x128xf32>
    %6 = arith.addf %2, %5 : vector<16x128xf32>
    %7 = arith.truncf %6 : vector<16x128xf32> to vector<16x128xbf16>
    %c0_5 = arith.constant 0 : index
    %c0_6 = arith.constant 0 : index
    %c0_7 = arith.constant 0 : index
    %8 = vector.load %arg4[%c0_5, %c0_6, %c0_7] : memref<2x128x128xbf16, #tpu.memory_space<vmem>>, vector<1x128x128xbf16>
    %9 = vector.shape_cast %8 : vector<1x128x128xbf16> to vector<128x128xbf16>
    %cst_8 = arith.constant dense<0.000000e+00> : vector<16x128xf32>
    %10 = tpu.matmul %7, %9, %cst_8 {dimension_numbers = #tpu.dot_dimension_numbers<[1], [0], [0], [1], [0, 0, 1, 1], [], []>} : vector<16x128xbf16>, vector<128x128xbf16>, vector<16x128xf32> -> vector<16x128xf32>
    %c0_9 = arith.constant 0 : index
    %c0_10 = arith.constant 0 : index
    %c0_11 = arith.constant 0 : index
    %11 = vector.load %arg5[%c0_9, %c0_10, %c0_11] : memref<2x1x128xbf16, #tpu.memory_space<vmem>>, vector<1x1x128xbf16>
    %12 = vector.shape_cast %11 : vector<1x1x128xbf16> to vector<1x128xbf16>
    %13 = arith.extf %12 : vector<1x128xbf16> to vector<1x128xf32>
    %14 = vector.broadcast %13 : vector<1x128xf32> to vector<16x128xf32>
    %15 = arith.addf %10, %14 : vector<16x128xf32>
    %cst_12 = arith.constant 0.000000e+00 : f32
    %16 = vector.broadcast %cst_12 : f32 to vector<16x128xf32>
    %17 = arith.maximumf %15, %16 : vector<16x128xf32>
    %18 = arith.truncf %17 : vector<16x128xf32> to vector<16x128xbf16>
    %c0_13 = arith.constant 0 : index
    %c0_14 = arith.constant 0 : index
    %c0_15 = arith.constant 0 : index
    %19 = vector.load %arg6[%c0_13, %c0_14, %c0_15] : memref<2x128x128xbf16, #tpu.memory_space<vmem>>, vector<1x128x128xbf16>
    %20 = vector.shape_cast %19 : vector<1x128x128xbf16> to vector<128x128xbf16>
    %cst_16 = arith.constant dense<0.000000e+00> : vector<16x128xf32>
    %21 = tpu.matmul %18, %20, %cst_16 {dimension_numbers = #tpu.dot_dimension_numbers<[1], [0], [0], [1], [0, 0, 1, 1], [], []>} : vector<16x128xbf16>, vector<128x128xbf16>, vector<16x128xf32> -> vector<16x128xf32>
    %c0_17 = arith.constant 0 : index
    %c0_18 = arith.constant 0 : index
    %c0_19 = arith.constant 0 : index
    %22 = vector.load %arg7[%c0_17, %c0_18, %c0_19] : memref<2x1x128xbf16, #tpu.memory_space<vmem>>, vector<1x1x128xbf16>
    %23 = vector.shape_cast %22 : vector<1x1x128xbf16> to vector<1x128xbf16>
    %24 = arith.extf %23 : vector<1x128xbf16> to vector<1x128xf32>
    %25 = vector.broadcast %24 : vector<1x128xf32> to vector<16x128xf32>
    %26 = arith.addf %21, %25 : vector<16x128xf32>
    %27 = arith.addf %6, %26 : vector<16x128xf32>
    %28 = arith.truncf %27 : vector<16x128xf32> to vector<16x128xbf16>
    %c1 = arith.constant 1 : index
    %c0_20 = arith.constant 0 : index
    %c0_21 = arith.constant 0 : index
    %29 = vector.load %arg4[%c1, %c0_20, %c0_21] : memref<2x128x128xbf16, #tpu.memory_space<vmem>>, vector<1x128x128xbf16>
    %30 = vector.shape_cast %29 : vector<1x128x128xbf16> to vector<128x128xbf16>
    %cst_22 = arith.constant dense<0.000000e+00> : vector<16x128xf32>
    %31 = tpu.matmul %28, %30, %cst_22 {dimension_numbers = #tpu.dot_dimension_numbers<[1], [0], [0], [1], [0, 0, 1, 1], [], []>} : vector<16x128xbf16>, vector<128x128xbf16>, vector<16x128xf32> -> vector<16x128xf32>
    %c1_23 = arith.constant 1 : index
    %c0_24 = arith.constant 0 : index
    %c0_25 = arith.constant 0 : index
    %32 = vector.load %arg5[%c1_23, %c0_24, %c0_25] : memref<2x1x128xbf16, #tpu.memory_space<vmem>>, vector<1x1x128xbf16>
    %33 = vector.shape_cast %32 : vector<1x1x128xbf16> to vector<1x128xbf16>
    %34 = arith.extf %33 : vector<1x128xbf16> to vector<1x128xf32>
    %35 = vector.broadcast %34 : vector<1x128xf32> to vector<16x128xf32>
    %36 = arith.addf %31, %35 : vector<16x128xf32>
    %cst_26 = arith.constant 0.000000e+00 : f32
    %37 = vector.broadcast %cst_26 : f32 to vector<16x128xf32>
    %38 = arith.maximumf %36, %37 : vector<16x128xf32>
    %39 = arith.truncf %38 : vector<16x128xf32> to vector<16x128xbf16>
    %c1_27 = arith.constant 1 : index
    %c0_28 = arith.constant 0 : index
    %c0_29 = arith.constant 0 : index
    %40 = vector.load %arg6[%c1_27, %c0_28, %c0_29] : memref<2x128x128xbf16, #tpu.memory_space<vmem>>, vector<1x128x128xbf16>
    %41 = vector.shape_cast %40 : vector<1x128x128xbf16> to vector<128x128xbf16>
    %cst_30 = arith.constant dense<0.000000e+00> : vector<16x128xf32>
    %42 = tpu.matmul %39, %41, %cst_30 {dimension_numbers = #tpu.dot_dimension_numbers<[1], [0], [0], [1], [0, 0, 1, 1], [], []>} : vector<16x128xbf16>, vector<128x128xbf16>, vector<16x128xf32> -> vector<16x128xf32>
    %c1_31 = arith.constant 1 : index
    %c0_32 = arith.constant 0 : index
    %c0_33 = arith.constant 0 : index
    %43 = vector.load %arg7[%c1_31, %c0_32, %c0_33] : memref<2x1x128xbf16, #tpu.memory_space<vmem>>, vector<1x1x128xbf16>
    %44 = vector.shape_cast %43 : vector<1x1x128xbf16> to vector<1x128xbf16>
    %45 = arith.extf %44 : vector<1x128xbf16> to vector<1x128xf32>
    %46 = vector.broadcast %45 : vector<1x128xf32> to vector<16x128xf32>
    %47 = arith.addf %42, %46 : vector<16x128xf32>
    %48 = arith.addf %27, %47 : vector<16x128xf32>
    %49 = arith.truncf %48 : vector<16x128xf32> to vector<16x128xbf16>
    %c0_34 = arith.constant 0 : index
    %c0_35 = arith.constant 0 : index
    %50 = vector.load %arg8[%c0_34, %c0_35] : memref<128x128xbf16, #tpu.memory_space<vmem>>, vector<128x128xbf16>
    %cst_36 = arith.constant dense<0.000000e+00> : vector<16x128xf32>
    %51 = tpu.matmul %49, %50, %cst_36 {dimension_numbers = #tpu.dot_dimension_numbers<[1], [0], [0], [1], [0, 0, 1, 1], [], []>} : vector<16x128xbf16>, vector<128x128xbf16>, vector<16x128xf32> -> vector<16x128xf32>
    %c0_37 = arith.constant 0 : index
    %c0_38 = arith.constant 0 : index
    %52 = vector.load %arg9[%c0_37, %c0_38] : memref<1x128xbf16, #tpu.memory_space<vmem>>, vector<1x128xbf16>
    %53 = arith.extf %52 : vector<1x128xbf16> to vector<1x128xf32>
    %54 = vector.broadcast %53 : vector<1x128xf32> to vector<16x128xf32>
    %55 = arith.addf %51, %54 : vector<16x128xf32>
    %56 = arith.truncf %55 : vector<16x128xf32> to vector<16x128xbf16>
    %c0_39 = arith.constant 0 : index
    %c0_40 = arith.constant 0 : index
    %57 = vector.load %arg10[%c0_39, %c0_40] : memref<16x128xbf16, #tpu.memory_space<vmem>>, vector<16x128xbf16>
    tpu.vector_store %arg10[%c0_39, %c0_40], %56 {strides = array<i32>} : memref<16x128xbf16, #tpu.memory_space<vmem>>, vector<16x128xbf16>,
    return
  }
  func.func @transform_0(%arg0: i32) -> (i32, i32) {
    %c0_i32 = arith.constant 0 : i32
    %c0_i32_0 = arith.constant 0 : i32
    return %arg0, %c0_i32 : i32, i32
  }
  func.func @transform_1(%arg0: i32) -> (i32, i32) {
    %c0_i32 = arith.constant 0 : i32
    %c0_i32_0 = arith.constant 0 : i32
    %c0_i32_1 = arith.constant 0 : i32
    return %c0_i32, %c0_i32_0 : i32, i32
  }
  func.func @transform_2(%arg0: i32) -> (i32, i32) {
    %c0_i32 = arith.constant 0 : i32
    %c0_i32_0 = arith.constant 0 : i32
    %c0_i32_1 = arith.constant 0 : i32
    return %c0_i32, %c0_i32_0 : i32, i32
  }
  func.func @transform_3(%arg0: i32) -> (i32, i32, i32) {
    %c0_i32 = arith.constant 0 : i32
    %c0_i32_0 = arith.constant 0 : i32
    %c0_i32_1 = arith.constant 0 : i32
    %c0_i32_2 = arith.constant 0 : i32
    return %c0_i32, %c0_i32_0, %c0_i32_1 : i32, i32, i32
  }
  func.func @transform_4(%arg0: i32) -> (i32, i32, i32) {
    %c0_i32 = arith.constant 0 : i32
    %c0_i32_0 = arith.constant 0 : i32
    %c0_i32_1 = arith.constant 0 : i32
    %c0_i32_2 = arith.constant 0 : i32
    return %c0_i32, %c0_i32_0, %c0_i32_1 : i32, i32, i32
  }
  func.func @transform_5(%arg0: i32) -> (i32, i32, i32) {
    %c0_i32 = arith.constant 0 : i32
    %c0_i32_0 = arith.constant 0 : i32
    %c0_i32_1 = arith.constant 0 : i32
    %c0_i32_2 = arith.constant 0 : i32
    return %c0_i32, %c0_i32_0, %c0_i32_1 : i32, i32, i32
  }
  func.func @transform_6(%arg0: i32) -> (i32, i32, i32) {
    %c0_i32 = arith.constant 0 : i32
    %c0_i32_0 = arith.constant 0 : i32
    %c0_i32_1 = arith.constant 0 : i32
    %c0_i32_2 = arith.constant 0 : i32
    return %c0_i32, %c0_i32_0, %c0_i32_1 : i32, i32, i32
  }
  func.func @transform_7(%arg0: i32) -> (i32, i32) {
    %c0_i32 = arith.constant 0 : i32
    %c0_i32_0 = arith.constant 0 : i32
    %c0_i32_1 = arith.constant 0 : i32
    return %c0_i32, %c0_i32_0 : i32, i32
  }
  func.func @transform_8(%arg0: i32) -> (i32, i32) {
    %c0_i32 = arith.constant 0 : i32
    %c0_i32_0 = arith.constant 0 : i32
    %c0_i32_1 = arith.constant 0 : i32
    return %c0_i32, %c0_i32_0 : i32, i32
  }
  func.func @transform_9(%arg0: i32) -> (i32, i32) {
    %c0_i32 = arith.constant 0 : i32
    %c0_i32_0 = arith.constant 0 : i32
    return %arg0, %c0_i32 : i32, i32
  }
}

</mosaic_0001>

<bundles_post_ra>
// kernel: tpu_custom_call.1
= control target key start
LH: loop header
LB: loop body
LE: loop exit
PB: predicated region body
PF: predicated region fallthrough
CT: control target
= control target key end

     0   :  { %14 = vsyncpa [#allocation3], 0  ;;  %s1353_s0 = inlined_call_operand.hbm [shape: bf16[16,32], index: 0, kind: input, shape index: {}]   ;;  %s1354_s1 = inlined_call_operand.hbm [shape: bf16[32,128], index: 1, kind: input, shape index: {}]   ;;  %s1355_s2 = inlined_call_operand.vmem [shape: bf16[1,128], index: 2, kind: input, shape index: {}]   ;;  %s1356_s3 = inlined_call_operand.hbm [shape: bf16[2,128,128], index: 3, kind: input, shape index: {}]   ;;  %s1357_s4 = inlined_call_operand.vmem [shape: bf16[2,1,128], index: 4, kind: input, shape index: {}]   ;;  %s1358_s5 = inlined_call_operand.hbm [shape: bf16[2,128,128], index: 5, kind: input, shape index: {}]   ;;  %s1359_s6 = inlined_call_operand.vmem [shape: bf16[2,1,128], index: 6, kind: input, shape index: {}]   ;;  %s1360_s7 = inlined_call_operand.hbm [shape: bf16[128,128], index: 7, kind: input, shape index: {}]   ;;  %s1361_s8 = inlined_call_operand.vmem [shape: bf16[1,128], index: 8, kind: input, shape index: {}]   ;;  %s1362_s9 = inlined_call_operand.hbm [shape: bf16[16,128], index: 9, kind: output, shape index: {}]  }
   0x1   :  { %15 = vsyncpa [#allocation6], 0 }
   0x2   :  { %16 = vsyncpa [#allocation9], 0 }
   0x3   :  { %17 = vsyncpa [#allocation4], 0  ;;  %s1169_s30 = smov [#allocation5]   ;;  %s1170_s11 = smov [#allocation8]  }
   0x4   :  { %s35_s10 = sshll.u32 %s1169_s30, 4  ;;  %s63_s12 = sshll.u32 %s1170_s11, 4  ;;  %s36_s10 = int_to_ptr.vmem [resolvable:$true] %s35_s10  ;;  %s64_s12 = int_to_ptr.vmem [resolvable:$true] %s63_s12 }
   0x5   :  { %s1049_s13 = scalar_lea.vmem %s36_s10, 256  ;;  %p1054_p1 = scmp.lt.s32.totalorder %s36_s10, %s36_s10 }
   0x6   :  { %p1050_p0 = scmp.ne.s32.totalorder %s36_s10, %s1049_s13  ;;  %p1055_p2 = scmp.lt.s32.totalorder %s1049_s13, %s1049_s13 }
   0x8   :  { %p1056_p3 = por %p1055_p2, %p1054_p1 }
   0xa   :  { %p1057_p4 = pnand %p1056_p3, %p1050_p0 }
   0xc   :  { %1060 = shalt.err (!%p1057_p4)
}
   0xd   :  { %s1171_s14 = smov 64   ;;  %s1172_s15 = smov 4  }
   0xe   :  { %41 = dma.hbm_to_vmem [thread:$0]  %s1354_s1, 256, %s36_s10, [#allocation6], %s1171_s14, %s1171_s14, %s1172_s15  }
   0xf   :  { %s1069_s18 = scalar_lea.vmem %s64_s12, 2048  ;;  %p1074_p6 = scmp.lt.s32.totalorder %s64_s12, %s64_s12 }
  0x10   :  { %p1070_p5 = scmp.ne.s32.totalorder %s64_s12, %s1069_s18  ;;  %p1075_p7 = scmp.lt.s32.totalorder %s1069_s18, %s1069_s18 }
  0x12   :  { %p1076_p8 = por %p1075_p7, %p1074_p6 }
  0x14   :  { %p1077_p9 = pnand %p1076_p8, %p1070_p5 }
  0x16   :  { %1080 = shalt.err (!%p1077_p9)
}
  0x17   :  { %69 = dma.hbm_to_vmem [thread:$0]  %s1358_s5, 2048, %s64_s12, [#allocation9], %s1171_s14, %s1171_s14, %s1172_s15  }
  0x18   :  { %s1173_s21 = smov [#allocation2]   ;;  %s1174_s23 = smov [#allocation7]  }
  0x19   :  { %s23_s22 = sshll.u32 %s1173_s21, 4  ;;  %s49_s24 = sshll.u32 %s1174_s23, 4  ;;  %s24_s22 = int_to_ptr.vmem [resolvable:$true] %s23_s22  ;;  %s50_s24 = int_to_ptr.vmem [resolvable:$true] %s49_s24 }
  0x1a   :  { %s1089_s1 = scalar_lea.vmem %s24_s22, 128  ;;  %p1094_p11 = scmp.lt.s32.totalorder %s24_s22, %s24_s22 }
  0x1b   :  { %p1090_p10 = scmp.ne.s32.totalorder %s24_s22, %s1089_s1  ;;  %p1095_p12 = scmp.lt.s32.totalorder %s1089_s1, %s1089_s1 }
  0x1d   :  { %p1096_p13 = por %p1095_p12, %p1094_p11 }
  0x1f   :  { %p1097_p0 = pnand %p1096_p13, %p1090_p10 }
  0x21   :  { %1100 = shalt.err (!%p1097_p0)
}
  0x22   :  { %29 = dma.hbm_to_vmem [thread:$0]  %s1353_s0, 128, %s24_s22, [#allocation3], %s1171_s14, %s1171_s14, %s1172_s15  }
  0x23   :  { %s1109_s5 = scalar_lea.vmem %s50_s24, 2048  ;;  %p1114_p2 = scmp.lt.s32.totalorder %s50_s24, %s50_s24 }
  0x24   :  { %p1110_p1 = scmp.ne.s32.totalorder %s50_s24, %s1109_s5  ;;  %p1115_p3 = scmp.lt.s32.totalorder %s1109_s5, %s1109_s5 }
  0x26   :  { %p1116_p4 = por %p1115_p3, %p1114_p2 }
  0x28   :  { %p1117_p5 = pnand %p1116_p4, %p1110_p1 }
  0x2a   :  { %1120 = shalt.err (!%p1117_p5)
}
  0x2b   :  { %55 = dma.hbm_to_vmem [thread:$0]  %s1356_s3, 2048, %s50_s24, [#allocation6], %s1171_s14, %s1171_s14, %s1172_s15  }
  0x2c   :  { %s1175_s29 = smov [#allocation10]  }
  0x2d   :  { %s77_s30 = sshll.u32 %s1175_s29, 4  ;;  %s78_s30 = int_to_ptr.vmem [resolvable:$true] %s77_s30 }
  0x2e   :  { %s1129_s10 = scalar_lea.vmem %s78_s30, 1024  ;;  %p1134_p7 = scmp.lt.s32.totalorder %s78_s30, %s78_s30 }
  0x2f   :  { %p1130_p6 = scmp.ne.s32.totalorder %s78_s30, %s1129_s10  ;;  %p1135_p8 = scmp.lt.s32.totalorder %s1129_s10, %s1129_s10 }
  0x31   :  { %p1136_p9 = por %p1135_p8, %p1134_p7 }
  0x33   :  { %p1137_p10 = pnand %p1136_p9, %p1130_p6 }
  0x35   :  { %1140 = shalt.err (!%p1137_p10)
}
  0x36   :  { %83 = dma.hbm_to_vmem [thread:$0]  %s1360_s7, 1024, %s78_s30, [#allocation9], %s1171_s14, %s1171_s14, %s1172_s15  }
  0x37   :  { %1161 = dma.done.wait [#allocation3], 128  }
  0x38   :  { %1162 = vsyncadd [#allocation3], 4294967168 }
  0x39   :  { %1163 = dma.done.wait [#allocation6], 2304  }
  0x3a   :  { %1164 = vsyncadd [#allocation6], 4294964992 }
  0x3b   :  { %1165 = dma.done.wait [#allocation9], 3072  }
  0x3c   :  { %1166 = vsyncadd [#allocation9], 4294964224  ;;  %v1176_v0 = vmov 0.0   ;;  %vm1177_vm0 = vmmov 0   ;;  %v998_v1 = vld [vmem:[#allocation5 + $0x8] sm:$0xff]   ;;  %v999_v2 = vld [vmem:[#allocation5] sm:$0xff]   ;;  %v110_v17 = vlaneseq }
  0x3d   :  { %880 = vmatprep.subr.bf16.mxu0 %v1176_v0  ;;  %884 = vmatprep.mubr.msk.bf16.mxu0 %vm1177_vm0, %v1176_v0  ;;  %v1001_v3 = vld [vmem:[#allocation7 + $0x38] sm:$0xff]   ;;  %v1000_v4 = vld [vmem:[#allocation2] sm:$0xff]   ;;  %v1002_v5 = vld [vmem:[#allocation7 + $0x30] sm:$0xff]   ;;  %vm131_vm1 = vcmask 261120  }
  0x3e   :  { %888 = vmatprep.subr.bf16.mxu1 %v1176_v0  ;;  %904 = vmatprep.mubr.msk.bf16.mxu1 %vm1177_vm0, %v1176_v0  ;;  %v1003_v6 = vld [vmem:[#allocation7 + $0x28] sm:$0xff]   ;;  %v1004_v7 = vld [vmem:[#allocation7 + $0x20] sm:$0xff]   ;;  %v1005_v8 = vld [vmem:[#allocation7 + $0x18] sm:$0xff]   ;;  %v111_v18 = vshrl.u32 %v110_v17, 7 }
  0x3f   :  { %881 = vmatpush3.bf16.msra.mxu0 %v998_v1  ;;  %889 = vmatpush3.bf16.msra.mxu1 %v1001_v3  ;;  %v1006_v9 = vld [vmem:[#allocation7 + $0x10] sm:$0xff]   ;;  %v1007_v10 = vld [vmem:[#allocation7 + $0x8] sm:$0xff]   ;;  %v1008_v11 = vld [vmem:[#allocation7] sm:$0xff]  }
  0x40   :  { %882 = vmatprep.subr.bf16.mxu0 %v1176_v0  ;;  %890 = vmatprep.subr.bf16.mxu1 %v1176_v0  ;;  %v1009_v12 = vld [vmem:[#allocation8 + $0x38] sm:$0xff]   ;;  %v1010_v13 = vld [vmem:[#allocation8 + $0x30] sm:$0xff]   ;;  %v1011_v14 = vld [vmem:[#allocation8 + $0x28] sm:$0xff]   ;;  %v1285_v21 = vsub.s32 0, %v111_v18 }
  0x41   :  { %v1012_v15 = vld [vmem:[#allocation8 + $0x20] sm:$0xff]   ;;  %v1013_v16 = vld [vmem:[#allocation8 + $0x18] sm:$0xff]   ;;  %v108_v19 = vld [vmem:[%s1355_s2] sm:$0x1] }
  0x42   :  { %v109_v20 = vunpack.c.l.bf16 %v108_v19  ;;  %v1014_v30 = vld [vmem:[#allocation8 + $0x10] sm:$0xff]   ;;  %v1015_v31 = vld [vmem:[#allocation8 + $0x8] sm:$0xff]   ;;  %v1016_v32 = vld [vmem:[#allocation8] sm:$0xff]  }
  0x43   :  { %883 = vmatpush3.bf16.msra.mxu0 %v999_v2  ;;  %891 = vmatpush3.bf16.msra.mxu1 %v1002_v5  ;;  %v1017_v33 = vld [vmem:[#allocation7 + $0x78] sm:$0xff]   ;;  %v1018_v34 = vld [vmem:[#allocation7 + $0x70] sm:$0xff]   ;;  %v1019_v35 = vld [vmem:[#allocation7 + $0x68] sm:$0xff]  }
  0x44   :  { %908 = vmatprep.subr.bf16.mxu0 %v1176_v0  ;;  %892 = vmatprep.subr.bf16.mxu1 %v1176_v0  ;;  %v113_v23 = vrot.slane %v109_v20, %v1285_v21  ;;  %v1020_v36 = vld [vmem:[#allocation7 + $0x60] sm:$0xff]   ;;  %v1021_v37 = vld [vmem:[#allocation7 + $0x58] sm:$0xff]   ;;  %v193_v38 = vld [vmem:[%s1357_s4] sm:$0x1] }
  0x45   :  { %v194_v39 = vunpack.c.l.bf16 %v193_v38  ;;  %v1022_v50 = vld [vmem:[#allocation7 + $0x50] sm:$0xff]   ;;  %v1023_v51 = vld [vmem:[#allocation7 + $0x48] sm:$0xff]   ;;  %v1024_v52 = vld [vmem:[#allocation7 + $0x40] sm:$0xff]  }
  0x46   :  { %885 = vmatmul.mubr.msk.bf16.vlgmr.msra.gmra.mxu0 %vm131_vm1, %v1000_v4  ;;  %v1025_v53 = vld [vmem:[#allocation8 + $0x78] sm:$0xff]   ;;  %v1026_v54 = vld [vmem:[#allocation8 + $0x70] sm:$0xff]   ;;  %v1027_v55 = vld [vmem:[#allocation8 + $0x68] sm:$0xff]  }
  0x47   :  { %924 = vmatprep.mubr.msk.bf16.mxu0 %vm1177_vm0, %v1176_v0  ;;  %893 = vmatpush3.bf16.msra.mxu1 %v1003_v6  ;;  %v198_v40 = vrot.slane %v194_v39, %v1285_v21  ;;  %v1028_v56 = vld [vmem:[#allocation8 + $0x60] sm:$0xff]   ;;  %v1029_v57 = vld [vmem:[#allocation8 + $0x58] sm:$0xff]   ;;  %v307_v58 = vld [vmem:[%s1359_s6] sm:$0x1] }
  0x48   :  { %894 = vmatprep.subr.bf16.mxu1 %v1176_v0  ;;  %909 = vmatpush3.bf16.msra.mxu0 %v1009_v12  ;;  %v308_v59 = vunpack.c.l.bf16 %v307_v58  ;;  %v1035_v12 = vld [vmem:[#allocation10 + $0x28] sm:$0xff]  }
  0x49   :  { %910 = vmatprep.subr.bf16.mxu0 %v1176_v0 }
  0x4a   :  { %v312_v60 = vrot.slane %v308_v59, %v1285_v21 }
  0x4b   :  { %895 = vmatpush3.bf16.msra.mxu1 %v1004_v7  ;;  %v1030_v7 = vld [vmem:[#allocation8 + $0x50] sm:$0xff]  }
  0x4c   :  { %896 = vmatprep.subr.bf16.mxu1 %v1176_v0  ;;  %911 = vmatpush3.bf16.msra.mxu0 %v1010_v13  ;;  %v1036_v13 = vld [vmem:[#allocation10 + $0x20] sm:$0xff]  }
  0x4d   :  { %912 = vmatprep.subr.bf16.mxu0 %v1176_v0 }
  0x4f   :  { %897 = vmatpush3.bf16.msra.mxu1 %v1005_v8  ;;  %v1031_v8 = vld [vmem:[#allocation8 + $0x48] sm:$0xff]  }
  0x50   :  { %898 = vmatprep.subr.bf16.mxu1 %v1176_v0  ;;  %913 = vmatpush3.bf16.msra.mxu0 %v1011_v14  ;;  %v1037_v14 = vld [vmem:[#allocation10 + $0x18] sm:$0xff]  }
  0x51   :  { %914 = vmatprep.subr.bf16.mxu0 %v1176_v0 }
  0x53   :  { %899 = vmatpush3.bf16.msra.mxu1 %v1006_v9  ;;  %v1032_v9 = vld [vmem:[#allocation8 + $0x40] sm:$0xff]  }
  0x54   :  { %900 = vmatprep.subr.bf16.mxu1 %v1176_v0  ;;  %915 = vmatpush3.bf16.msra.mxu0 %v1012_v15  ;;  %v797_v15 = vld [vmem:[%s1357_s4 + $0x1] sm:$0x1] }
  0x55   :  { %916 = vmatprep.subr.bf16.mxu0 %v1176_v0 }
  0x57   :  { %901 = vmatpush3.bf16.msra.mxu1 %v1007_v10  ;;  %v1033_v10 = vld [vmem:[#allocation10 + $0x38] sm:$0xff]  }
  0x58   :  { %902 = vmatprep.subr.bf16.mxu1 %v1176_v0  ;;  %917 = vmatpush3.bf16.msra.mxu0 %v1013_v16  ;;  %v424_v16 = vunpack.c.l.bf16 %v797_v15 }
  0x59   :  { %918 = vmatprep.subr.bf16.mxu0 %v1176_v0 }
  0x5a   :  { %v428_v17 = vrot.slane %v424_v16, %v1285_v21 }
  0x5b   :  { %903 = vmatpush3.bf16.msra.mxu1 %v1008_v11  ;;  %v1034_v11 = vld [vmem:[#allocation10 + $0x30] sm:$0xff]  }
  0x5c   :  { %928 = vmatprep.subr.bf16.mxu1 %v1176_v0  ;;  %919 = vmatpush3.bf16.msra.mxu0 %v1014_v30  ;;  %v1040_v30 = vld [vmem:[#allocation10] sm:$0xff]  }
  0x5d   :  { %920 = vmatprep.subr.bf16.mxu0 %v1176_v0 }
  0x60   :  { %921 = vmatpush3.bf16.msra.mxu0 %v1015_v31  ;;  %v806_v31 = vld [vmem:[%s1359_s6 + $0x1] sm:$0x1]  ;;  %s1178_s6 = smov [#allocation11]  }
  0x61   :  { %922 = vmatprep.subr.bf16.mxu0 %v1176_v0  ;;  %s763_s22 = sshll.u32 %s1178_s6, 4  ;;  %s764_s22 = int_to_ptr.vmem [resolvable:$true] %s763_s22 }
  0x62   :  { %s1141_s23 = scalar_lea.vmem %s764_s22, 128  ;;  %p1146_p12 = scmp.lt.s32.totalorder %s764_s22, %s764_s22 }
  0x63   :  { %p1142_p11 = scmp.ne.s32.totalorder %s764_s22, %s1141_s23  ;;  %p1147_p13 = scmp.lt.s32.totalorder %s1141_s23, %s1141_s23 }
  0x64   :  { %923 = vmatpush3.bf16.msra.mxu0 %v1016_v32  ;;  %v540_v32 = vunpack.c.l.bf16 %v806_v31 }
  0x65   :  { %948 = vmatprep.subr.bf16.mxu0 %v1176_v0  ;;  %p1148_p0 = por %p1147_p13, %p1146_p12 }
  0x67   :  { %p1149_p1 = pnand %p1148_p0, %p1142_p11 }
 0x106   :  { %v169_v22 = vpop.f32.mrf.mxu0 }
 0x107   :  { %v1288_v26 = vadd.f32 %v169_v22, %v113_v23 }
 0x108   :  { %v886_v24 = vpop.f32.mrf.mxu0 }
 0x10a   :  { %v172_v25 = vpop.f32.mrf.mxu0 }
 0x10b   :  { %v1290_v27 = vadd.f32 %v172_v25, %v113_v23 }
 0x10c   :  { %v887_v28 = vpop.f32.mrf.mxu0 }
 0x10d   :  { %v176_v29 = vpack.c.bf16 %v1290_v27, %v1288_v26  ;;  %v1038_v28 = vld [vmem:[#allocation10 + $0x10] sm:$0xff]  }
 0x10f   :  { %905 = vmatmul.mubr.bf16.vlgmr.msra.gmra.mxu1 %v176_v29  ;;  %v1039_v29 = vld [vmem:[#allocation10 + $0x8] sm:$0xff]  }
 0x110   :  { %944 = vmatprep.mubr.msk.bf16.mxu1 %vm1177_vm0, %v1176_v0  ;;  %929 = vmatpush3.bf16.msra.mxu1 %v1017_v33  ;;  %v544_v33 = vrot.slane %v540_v32, %v1285_v21 }
 0x111   :  { %930 = vmatprep.subr.bf16.mxu1 %v1176_v0 }
 0x114   :  { %931 = vmatpush3.bf16.msra.mxu1 %v1018_v34 }
 0x115   :  { %932 = vmatprep.subr.bf16.mxu1 %v1176_v0 }
 0x118   :  { %933 = vmatpush3.bf16.msra.mxu1 %v1019_v35 }
 0x119   :  { %934 = vmatprep.subr.bf16.mxu1 %v1176_v0 }
 0x11c   :  { %935 = vmatpush3.bf16.msra.mxu1 %v1020_v36 }
 0x11d   :  { %936 = vmatprep.subr.bf16.mxu1 %v1176_v0 }
 0x120   :  { %937 = vmatpush3.bf16.msra.mxu1 %v1021_v37 }
 0x121   :  { %938 = vmatprep.subr.bf16.mxu1 %v1176_v0 }
 0x124   :  { %939 = vmatpush3.bf16.msra.mxu1 %v1022_v50 }
 0x125   :  { %940 = vmatprep.subr.bf16.mxu1 %v1176_v0 }
 0x128   :  { %941 = vmatpush3.bf16.msra.mxu1 %v1023_v51 }
 0x129   :  { %942 = vmatprep.subr.bf16.mxu1 %v1176_v0 }
 0x12c   :  { %943 = vmatpush3.bf16.msra.mxu1 %v1024_v52 }
 0x12d   :  { %968 = vmatprep.subr.bf16.mxu1 %v1176_v0 }
 0x1cf   :  { %v281_v41 = vpop.f32.mrf.mxu1 }
 0x1d0   :  { %v282_v43 = vadd.f32 %v281_v41, %v198_v40 }
 0x1d1   :  { %v906_v42 = vpop.f32.mrf.mxu1 }
 0x1d2   :  { %v288_v47 = vmax.f32 %v282_v43, 0.0 }
 0x1d3   :  { %v284_v44 = vpop.f32.mrf.mxu1 }
 0x1d4   :  { %v285_v45 = vadd.f32 %v284_v44, %v198_v40 }
 0x1d5   :  { %v907_v46 = vpop.f32.mrf.mxu1 }
 0x1d6   :  { %v289_v48 = vmax.f32 %v285_v45, 0.0 }
 0x1d8   :  { %v290_v49 = vpack.c.bf16 %v289_v48, %v288_v47 }
 0x1da   :  { %925 = vmatmul.mubr.bf16.vlgmr.msra.gmra.mxu0 %v290_v49 }
 0x1db   :  { %964 = vmatprep.mubr.msk.bf16.mxu0 %vm1177_vm0, %v1176_v0  ;;  %949 = vmatpush3.bf16.msra.mxu0 %v1025_v53 }
 0x1dc   :  { %950 = vmatprep.subr.bf16.mxu0 %v1176_v0 }
 0x1df   :  { %951 = vmatpush3.bf16.msra.mxu0 %v1026_v54 }
 0x1e0   :  { %952 = vmatprep.subr.bf16.mxu0 %v1176_v0 }
 0x1e3   :  { %953 = vmatpush3.bf16.msra.mxu0 %v1027_v55 }
 0x1e4   :  { %954 = vmatprep.subr.bf16.mxu0 %v1176_v0 }
 0x1e7   :  { %955 = vmatpush3.bf16.msra.mxu0 %v1028_v56 }
 0x1e8   :  { %956 = vmatprep.subr.bf16.mxu0 %v1176_v0 }
 0x1eb   :  { %957 = vmatpush3.bf16.msra.mxu0 %v1029_v57 }
 0x1ec   :  { %958 = vmatprep.subr.bf16.mxu0 %v1176_v0 }
 0x1ef   :  { %959 = vmatpush3.bf16.msra.mxu0 %v1030_v7 }
 0x1f0   :  { %960 = vmatprep.subr.bf16.mxu0 %v1176_v0 }
 0x1f3   :  { %961 = vmatpush3.bf16.msra.mxu0 %v1031_v8 }
 0x1f4   :  { %962 = vmatprep.subr.bf16.mxu0 %v1176_v0 }
 0x1f7   :  { %963 = vmatpush3.bf16.msra.mxu0 %v1032_v9 }
 0x29a   :  { %v395_v61 = vpop.f32.mrf.mxu0 }
 0x29b   :  { %v396_v63 = vadd.f32 %v395_v61, %v312_v60 }
 0x29c   :  { %v926_v62 = vpop.f32.mrf.mxu0 }
 0x29d   :  { %v402_v4 = vadd.f32 %v396_v63, %v1288_v26 }
 0x29e   :  { %v398_v1 = vpop.f32.mrf.mxu0 }
 0x29f   :  { %v399_v2 = vadd.f32 %v398_v1, %v312_v60 }
 0x2a0   :  { %v927_v3 = vpop.f32.mrf.mxu0 }
 0x2a1   :  { %v403_v5 = vadd.f32 %v399_v2, %v1290_v27 }
 0x2a3   :  { %v404_v6 = vpack.c.bf16 %v403_v5, %v402_v4 }
 0x2a5   :  { %945 = vmatmul.mubr.bf16.vlgmr.msra.gmra.mxu1 %v404_v6 }
 0x2a6   :  { %984 = vmatprep.mubr.msk.bf16.mxu1 %vm1177_vm0, %v1176_v0  ;;  %969 = vmatpush3.bf16.msra.mxu1 %v1033_v10 }
 0x2a7   :  { %970 = vmatprep.subr.bf16.mxu1 %v1176_v0 }
 0x2aa   :  { %971 = vmatpush3.bf16.msra.mxu1 %v1034_v11 }
 0x2ab   :  { %972 = vmatprep.subr.bf16.mxu1 %v1176_v0 }
 0x2ae   :  { %973 = vmatpush3.bf16.msra.mxu1 %v1035_v12 }
 0x2af   :  { %974 = vmatprep.subr.bf16.mxu1 %v1176_v0 }
 0x2b2   :  { %975 = vmatpush3.bf16.msra.mxu1 %v1036_v13 }
 0x2b3   :  { %976 = vmatprep.subr.bf16.mxu1 %v1176_v0 }
 0x2b6   :  { %977 = vmatpush3.bf16.msra.mxu1 %v1037_v14 }
 0x2b7   :  { %978 = vmatprep.subr.bf16.mxu1 %v1176_v0 }
 0x2ba   :  { %979 = vmatpush3.bf16.msra.mxu1 %v1038_v28 }
 0x2bb   :  { %980 = vmatprep.subr.bf16.mxu1 %v1176_v0 }
 0x2be   :  { %981 = vmatpush3.bf16.msra.mxu1 %v1039_v29 }
 0x2bf   :  { %982 = vmatprep.subr.bf16.mxu1 %v1176_v0  ;;  %v653_v0 = vld [vmem:[%s1361_s8] sm:$0x1] }
 0x2c0   :  { %v654_v43 = vunpack.c.l.bf16 %v653_v0 }
 0x2c2   :  { %983 = vmatpush3.bf16.msra.mxu1 %v1040_v30  ;;  %v658_v45 = vrot.slane %v654_v43, %v1285_v21 }
 0x365   :  { %v511_v18 = vpop.f32.mrf.mxu1 }
 0x366   :  { %v512_v20 = vadd.f32 %v511_v18, %v428_v17 }
 0x367   :  { %v946_v19 = vpop.f32.mrf.mxu1 }
 0x368   :  { %v518_v25 = vmax.f32 %v512_v20, 0.0 }
 0x369   :  { %v514_v22 = vpop.f32.mrf.mxu1 }
 0x36a   :  { %v515_v23 = vadd.f32 %v514_v22, %v428_v17 }
 0x36b   :  { %v947_v24 = vpop.f32.mrf.mxu1 }
 0x36c   :  { %v519_v26 = vmax.f32 %v515_v23, 0.0 }
 0x36e   :  { %v520_v27 = vpack.c.bf16 %v519_v26, %v518_v25 }
 0x370   :  { %965 = vmatmul.mubr.bf16.vlgmr.msra.gmra.mxu0 %v520_v27 }
 0x430   :  { %v627_v34 = vpop.f32.mrf.mxu0 }
 0x431   :  { %v628_v36 = vadd.f32 %v627_v34, %v544_v33 }
 0x432   :  { %v966_v35 = vpop.f32.mrf.mxu0 }
 0x433   :  { %v634_v40 = vadd.f32 %v628_v36, %v402_v4 }
 0x434   :  { %v630_v37 = vpop.f32.mrf.mxu0 }
 0x435   :  { %v631_v38 = vadd.f32 %v630_v37, %v544_v33 }
 0x436   :  { %v967_v39 = vpop.f32.mrf.mxu0 }
 0x437   :  { %v635_v41 = vadd.f32 %v631_v38, %v403_v5 }
 0x439   :  { %v636_v42 = vpack.c.bf16 %v635_v41, %v634_v40 }
 0x43b   :  { %985 = vmatmul.mubr.bf16.vlgmr.msra.gmra.mxu1 %v636_v42 }
 0x4fb   :  { %v741_v44 = vpop.f32.mrf.mxu1 }
 0x4fc   :  { %v742_v48 = vadd.f32 %v741_v44, %v658_v45 }
 0x4fd   :  { %v986_v46 = vpop.f32.mrf.mxu1 }
 0x4ff   :  { %v744_v47 = vpop.f32.mrf.mxu1 }
 0x500   :  { %v745_v49 = vadd.f32 %v744_v47, %v658_v45 }
 0x501   :  { %v987_v50 = vpop.f32.mrf.mxu1 }
 0x502   :  { %v830_v51 = vpack.c.bf16 %v745_v49, %v742_v48 }
 0x504   :  { %831 = vst [vmem:[#allocation11] sm:$0xff] %v830_v51  }
 0x505   :  { %1152 = shalt.err (!%p1149_p1)
}
 0x506   :  { %769 = dma.vmem_to_hbm [thread:$0]  %s764_s22, 128, %s1362_s9, [#allocation4], %s1171_s14, %s1171_s14, %s1172_s15  }
 0x507   :  { %1167 = dma.done.wait [#allocation4], 128  }
 0x508   :  { %1168 = vsyncadd [#allocation4], 4294967168 }
 0x509   :  { %773 = vsyncpa [#allocation3], 1 }
 0x50a   :  { %774 = vsyncpa [#allocation6], 1 }
 0x50b   :  { %775 = vsyncpa [#allocation9], 1 }
 0x50c   :  { %776 = vsyncpa [#allocation4], 1 }

</bundles_post_ra>
